<compile_context>
chip_gen: v6e
topology: v6e:2x2x1
jax: 0.10.0
libtpu: 0.0.40
codegen_flags: <defaults>
</compile_context>

<pallas_src>
import functools

import jax
import jax.numpy as jnp
from jax.experimental import pallas as pl
from jax.experimental.pallas import tpu as pltpu


def _round_up(n: int, m: int) -> int:
    return ((n + m - 1) // m) * m


def _vmem_capacity_bytes() -> int:
    """Per-core VMEM capacity; falls back to the smallest (v7x, 64 MiB) value."""
    try:
        info = pltpu.get_tpu_info()
        for name in ("vmem_capacity_bytes", "vmem_size_bytes", "vmem_bytes"):
            v = getattr(info, name, None)
            if v:
                return min(int(v), 128 << 20)
    except Exception:
        pass
    try:
        kind = jax.devices()[0].device_kind.lower()
        if any(tag in kind for tag in ("v5e", "v5 lite", "v5lite", "v6e", "v6 lite")):
            return 128 << 20
    except Exception:
        pass
    return 64 << 20


def _vmem_usage_bytes(tm, tn, d, x_itemsize, has_dropout, multi_col) -> int:
    """Accurate per-kernel VMEM footprint (double-buffer factors counted once)."""
    usage = 2 * tm * d * x_itemsize            # full-width x blocks (LN input)
    usage += 2 * d * tn * 2                    # bf16 W blocks
    usage += 2 * 8 * tn * 4                    # bias blocks (sublane-padded to 8)
    usage += 2 * tm * tn * x_itemsize          # output blocks
    if multi_col:
        usage += 2 * tm * tn * x_itemsize      # column-tiled x blocks (residual add)
        usage += tm * d * 2                    # cached bf16 LayerNorm scratch (1 buffer)
    if has_dropout:
        usage += 2 * tm * tn * 2               # bf16 keep-mask blocks
    usage += tm * d * 4                        # headroom for in-kernel f32 temporaries
    return usage


def _choose_tiles(rows, d, vmem_cap, x_itemsize, has_dropout):
    """Pick (tm, tn) per generation from the real VMEM capacity.

    Preference order:
      1. tn == d  -> whole bf16 W resident, read from HBM exactly once
         (usually possible on the 128 MiB parts, v5e/v6e).
      2. Otherwise column-tile W and take the largest tm that fits so the
         (d, tn) W slab re-streamed per row tile is hidden under the matmul.
    """
    rows8 = _round_up(max(rows, 1), 8)
    tm_target = 1024 if vmem_cap >= (96 << 20) else 512   # 128 MiB parts vs v7x
    budget = int(vmem_cap * 0.75)                          # leave Mosaic headroom

    tm_start = min(tm_target, rows8)                       # multiple of 8
    tm_cands = [tm_start] + [v for v in (512, 256, 128, 64, 32, 16, 8) if v < tm_start]
    tn_cands = [d] + [t for t in (512, 256, 128) if t < d and d % t == 0]

    for tn in tn_cands:
        multi_col = tn != d
        for tm in tm_cands:
            if _vmem_usage_bytes(tm, tn, d, x_itemsize, has_dropout, multi_col) <= budget:
                return tm, tn
    return tm_cands[-1], 128


def residual_connection_kernel(x_ref, w_ref, b_ref, *rest, eps, ln_alpha, ln_bias,
                               has_dropout, multi_col, inv_keep):
    idx = 0
    if multi_col:
        xcol_ref = rest[idx]; idx += 1
    if has_dropout:
        mask_ref = rest[idx]; idx += 1
    o_ref = rest[idx]; idx += 1
    normed_ref = rest[idx] if multi_col else None

    d = x_ref.shape[-1]

    def layer_norm(xf32):
        # torch semantics: unbiased std (ddof=1), eps added to the std.
        mean = jnp.mean(xf32, axis=-1, keepdims=True)
        xc = xf32 - mean
        var = jnp.sum(xc * xc, axis=-1, keepdims=True) * (1.0 / float(d - 1))
        inv_std = 1.0 / (jnp.sqrt(var) + eps)
        return ln_alpha * (xc * inv_std) + ln_bias

    if multi_col:
        # LayerNorm + bf16 cast computed ONCE per row tile (at j == 0), cached in
        # VMEM scratch and reused by every W column tile (j axis is "arbitrary").
        @pl.when(pl.program_id(1) == 0)
        def _():
            normed_ref[...] = layer_norm(x_ref[...].astype(jnp.float32)).astype(jnp.bfloat16)
        normed = normed_ref[...]
        x_res = xcol_ref[...].astype(jnp.float32)
    else:
        x = x_ref[...].astype(jnp.float32)
        normed = layer_norm(x).astype(jnp.bfloat16)
        x_res = x

    # sublayer: Linear(D, D) column slab; bf16 MXU inputs, f32 accumulation.
    y = jnp.dot(normed, w_ref[...], preferred_element_type=jnp.float32)
    y = y + b_ref[...].astype(jnp.float32)                  # (1, tn) broadcast

    if has_dropout:
        # Inverted dropout: keep flags are exact 0/1 bf16, scaled by 1/(1-p) in f32.
        y = y * (mask_ref[...].astype(jnp.float32) * inv_keep)

    o_ref[...] = (x_res + y).astype(o_ref.dtype)


def residual_connection(x, w, b, *, dropout_p=0.0, rng_key=None, eps=1e-6,
                        ln_alpha=1.0, ln_bias=0.0, tile_override=None):
    """x: (B, S, D); w: (D, D); b: (1, D). Computes x + dropout(Linear(LayerNorm(x)))."""
    B, S, D = x.shape
    assert D % 128 == 0, "pad the feature dim to a multiple of 128 (lane width)"
    rows = B * S
    xf = x.reshape(rows, D)                      # contiguous reshape: no copy

    # Ragged rows: only pad to the 8-row sublane boundary when strictly needed;
    # partial last row blocks are handled by the pipeline's masked boundary DMA.
    rows_arr = rows
    if rows % 8 != 0:
        rows_arr = _round_up(rows, 8)
        xf = jnp.pad(xf, ((0, rows_arr - rows), (0, 0)))

    vmem_cap = _vmem_capacity_bytes()
    has_dropout = float(dropout_p) > 0.0

    if tile_override is not None:
        tm, tn = tile_override
        assert tm % 8 == 0 and D % tn == 0 and tn % 128 == 0
    else:
        tm, tn = _choose_tiles(rows_arr, D, vmem_cap, xf.dtype.itemsize, has_dropout)
    multi_col = tn != D
    grid = (pl.cdiv(rows_arr, tm), D // tn)

    w_bf16 = jnp.asarray(w).astype(jnp.bfloat16)   # MXU-native, halves W footprint
    b_row = jnp.asarray(b).reshape(1, D).astype(jnp.float32)

    operands = [xf, w_bf16, b_row]
    in_specs = [
        pl.BlockSpec((tm, D), lambda i, j: (i, 0)),    # x rows, full width (fetched once per i)
        pl.BlockSpec((D, tn), lambda i, j: (0, j)),    # W column slab
        pl.BlockSpec((1, tn), lambda i, j: (0, j)),    # bias slab
    ]
    if multi_col:
        # Same array again, column-tiled, for the residual add (avoids an
        # in-kernel dynamic lane-dim slice of the full-width block).
        operands.append(xf)
        in_specs.append(pl.BlockSpec((tm, tn), lambda i, j: (i, j)))
    if has_dropout:
        if rng_key is None:
            rng_key = jax.random.PRNGKey(0)
        # TODO(synk): generate the keep-mask on-chip (pltpu.prng_seed +
        # pltpu.prng_random_bits) to remove this HBM stream entirely; kept
        # host-side (bf16 0/1 keep flags, 2 B/elem vs the previous 4 B f32 mask)
        # because prng_seed previously failed to lower in this sandbox.
        keep = jax.random.bernoulli(rng_key, 1.0 - float(dropout_p), (rows_arr, D))
        operands.append(keep.astype(jnp.bfloat16))
        in_specs.append(pl.BlockSpec((tm, tn), lambda i, j: (i, j)))

    scratch_shapes = []
    if multi_col:
        scratch_shapes.append(pltpu.VMEM((tm, D), jnp.bfloat16))   # cached LN(x)

    kern = functools.partial(
        residual_connection_kernel, eps=float(eps),
        ln_alpha=float(ln_alpha), ln_bias=float(ln_bias),
        has_dropout=has_dropout, multi_col=multi_col,
        inv_keep=(1.0 / (1.0 - float(dropout_p))) if has_dropout else 1.0)

    usage = _vmem_usage_bytes(tm, tn, D, xf.dtype.itemsize, has_dropout, multi_col)
    vmem_limit = int(min(max(usage + (4 << 20), 16 << 20),
                         max(vmem_cap - (8 << 20), 16 << 20)))

    # TODO(synk): if profiles show the W-slab DMA still exposed at large D, add
    # pipeline_mode=pl.Buffered(3) to the W BlockSpec; on v7x an fp8 W path would
    # double MXU throughput if the accuracy budget allows.
    out = pl.pallas_call(
        kern,
        out_shape=jax.ShapeDtypeStruct((rows_arr, D), x.dtype),
        grid_spec=pltpu.PrefetchScalarGridSpec(
            num_scalar_prefetch=0,
            grid=grid,
            in_specs=in_specs,
            out_specs=pl.BlockSpec((tm, tn), lambda i, j: (i, j)),
            scratch_shapes=scratch_shapes,
        ),
        compiler_params=pltpu.CompilerParams(
            # i (row tiles) is independent -> megacore-shardable; j (column tiles)
            # carries the cached-LN scratch dependence -> sequential.
            dimension_semantics=("parallel", "arbitrary"),
            vmem_limit_bytes=vmem_limit),
    )(*operands)

    return out[:rows].reshape(B, S, D)


def _reference(x, w, b, eps=1e-6, keep=None, dropout_p=0.0):
    mean = jnp.mean(x, axis=-1, keepdims=True)
    std = jnp.std(x, axis=-1, keepdims=True, ddof=1)
    normed = (x - mean) / (std + eps)          # alpha=1, bias=0
    y = normed @ w + b
    if keep is not None:
        y = y * (keep / (1.0 - dropout_p))
    return x + y


if __name__ == "__main__":
    key = jax.random.PRNGKey(0)
    kx, kw, kb, kd, kx2, kw2, kb2 = jax.random.split(key, 7)

    # --- Case 1: eval mode (dropout = 0), full-W-resident (single column tile) path.
    B, S, D = 2, 8, 128
    x = jax.random.normal(kx, (B, S, D), dtype=jnp.float32)
    w = jax.random.normal(kw, (D, D), dtype=jnp.float32) * (1.0 / jnp.sqrt(D))
    b = jax.random.normal(kb, (1, D), dtype=jnp.float32) * 0.01

    out = residual_connection(x, w, b, dropout_p=0.0)
    jax.block_until_ready(out)
    ref = _reference(x, w, b)
    # Matmul runs in bf16 on the MXU (f32 accumulation) -> loosened tolerance.
    assert jnp.allclose(out, ref, atol=2e-2, rtol=2e-2), "eval-mode mismatch"

    # --- Case 2: training mode (dropout = 0.1), bf16 keep-mask path.
    out_drop = residual_connection(x, w, b, dropout_p=0.1, rng_key=kd)
    jax.block_until_ready(out_drop)
    keep = jax.random.bernoulli(kd, 1.0 - 0.1, (B * S, D)).astype(jnp.float32)
    ref_drop = _reference(x, w, b, keep=keep.reshape(B, S, D), dropout_p=0.1)
    assert jnp.allclose(out_drop, ref_drop, atol=2e-2, rtol=2e-2), "dropout mismatch"

    # --- Case 3: force the column-tiled path (cached-LN scratch + pl.when reuse).
    D2 = 256
    x2 = jax.random.normal(kx2, (B, S, D2), dtype=jnp.float32)
    w2 = jax.random.normal(kw2, (D2, D2), dtype=jnp.float32) * (1.0 / jnp.sqrt(D2))
    b2 = jax.random.normal(kb2, (1, D2), dtype=jnp.float32) * 0.01
    out2 = residual_connection(x2, w2, b2, dropout_p=0.0, tile_override=(8, 128))
    jax.block_until_ready(out2)
    ref2 = _reference(x2, w2, b2)
    assert jnp.allclose(out2, ref2, atol=2e-2, rtol=2e-2), "multi-column mismatch"

    print("KERNEL_OK")
</pallas_src>

<mosaic_0001>
module attributes {stable_mosaic.version = 11 : i64} {
  func.func @residual_connection_kernel(%arg0: i32, %arg1: i32, %arg2: memref<16x128xf32, #tpu.memory_space<vmem>>, %arg3: memref<128x128xbf16, #tpu.memory_space<vmem>>, %arg4: memref<1x128xf32, #tpu.memory_space<vmem>>, %arg5: memref<16x128xf32, #tpu.memory_space<vmem>>) attributes {dimension_semantics = [#tpu.dimension_semantics<parallel>, #tpu.dimension_semantics<arbitrary>], iteration_bounds = array<i64: 1, 1>, scalar_prefetch = 0 : i64, scratch_operands = 0 : i64, tpu.core_type = #tpu.core_type<tc>, window_params = [{transform_indices = @transform_0, window_bounds = array<i64: 16, 128>}, {transform_indices = @transform_1, window_bounds = array<i64: 128, 128>}, {transform_indices = @transform_2, window_bounds = array<i64: 1, 128>}, {transform_indices = @transform_3, window_bounds = array<i64: 16, 128>}]} {
    %c0 = arith.constant 0 : index
    %c0_0 = arith.constant 0 : index
    %0 = vector.load %arg2[%c0, %c0_0] : memref<16x128xf32, #tpu.memory_space<vmem>>, vector<16x128xf32>
    %cst = arith.constant dense<0.000000e+00> : vector<16xf32>
    %1 = vector.multi_reduction <add>, %0, %cst [1] : vector<16x128xf32> to vector<16xf32>
    %2 = vector.shape_cast %1 : vector<16xf32> to vector<16x1xf32>
    %cst_1 = arith.constant 1.280000e+02 : f32
    %3 = vector.broadcast %cst_1 : f32 to vector<16x1xf32>
    %4 = arith.divf %2, %3 : vector<16x1xf32>
    %5 = vector.broadcast %4 : vector<16x1xf32> to vector<16x128xf32>
    %6 = arith.subf %0, %5 : vector<16x128xf32>
    %7 = arith.mulf %6, %6 : vector<16x128xf32>
    %cst_2 = arith.constant dense<0.000000e+00> : vector<16xf32>
    %8 = vector.multi_reduction <add>, %7, %cst_2 [1] : vector<16x128xf32> to vector<16xf32>
    %9 = vector.shape_cast %8 : vector<16xf32> to vector<16x1xf32>
    %cst_3 = arith.constant 0.00787401571 : f32
    %10 = vector.broadcast %cst_3 : f32 to vector<16x1xf32>
    %11 = arith.mulf %9, %10 : vector<16x1xf32>
    %12 = math.sqrt %11 : vector<16x1xf32>
    %cst_4 = arith.constant 9.99999997E-7 : f32
    %13 = vector.broadcast %cst_4 : f32 to vector<16x1xf32>
    %14 = arith.addf %12, %13 : vector<16x1xf32>
    %cst_5 = arith.constant 1.000000e+00 : f32
    %15 = vector.broadcast %cst_5 : f32 to vector<16x1xf32>
    %16 = arith.divf %15, %14 : vector<16x1xf32>
    %17 = vector.broadcast %16 : vector<16x1xf32> to vector<16x128xf32>
    %18 = arith.mulf %6, %17 : vector<16x128xf32>
    %cst_6 = arith.constant 1.000000e+00 : f32
    %19 = vector.broadcast %cst_6 : f32 to vector<16x128xf32>
    %20 = arith.mulf %19, %18 : vector<16x128xf32>
    %cst_7 = arith.constant 0.000000e+00 : f32
    %21 = vector.broadcast %cst_7 : f32 to vector<16x128xf32>
    %22 = arith.addf %20, %21 : vector<16x128xf32>
    %23 = arith.truncf %22 : vector<16x128xf32> to vector<16x128xbf16>
    %c0_8 = arith.constant 0 : index
    %c0_9 = arith.constant 0 : index
    %24 = vector.load %arg3[%c0_8, %c0_9] : memref<128x128xbf16, #tpu.memory_space<vmem>>, vector<128x128xbf16>
    %cst_10 = arith.constant dense<0.000000e+00> : vector<16x128xf32>
    %25 = tpu.matmul %23, %24, %cst_10 {dimension_numbers = #tpu.dot_dimension_numbers<[1], [0], [0], [1], [0, 0, 1, 1], [], []>} : vector<16x128xbf16>, vector<128x128xbf16>, vector<16x128xf32> -> vector<16x128xf32>
    %c0_11 = arith.constant 0 : index
    %c0_12 = arith.constant 0 : index
    %26 = vector.load %arg4[%c0_11, %c0_12] : memref<1x128xf32, #tpu.memory_space<vmem>>, vector<1x128xf32>
    %27 = vector.broadcast %26 : vector<1x128xf32> to vector<16x128xf32>
    %28 = arith.addf %25, %27 : vector<16x128xf32>
    %29 = arith.addf %0, %28 : vector<16x128xf32>
    %c0_13 = arith.constant 0 : index
    %c0_14 = arith.constant 0 : index
    %30 = vector.load %arg5[%c0_13, %c0_14] : memref<16x128xf32, #tpu.memory_space<vmem>>, vector<16x128xf32>
    tpu.vector_store %arg5[%c0_13, %c0_14], %29 {strides = array<i32>} : memref<16x128xf32, #tpu.memory_space<vmem>>, vector<16x128xf32>,
    return
  }
  func.func @transform_0(%arg0: i32, %arg1: i32) -> (i32, i32) {
    %c0_i32 = arith.constant 0 : i32
    %c0_i32_0 = arith.constant 0 : i32
    return %arg0, %c0_i32 : i32, i32
  }
  func.func @transform_1(%arg0: i32, %arg1: i32) -> (i32, i32) {
    %c0_i32 = arith.constant 0 : i32
    %c0_i32_0 = arith.constant 0 : i32
    return %c0_i32, %arg1 : i32, i32
  }
  func.func @transform_2(%arg0: i32, %arg1: i32) -> (i32, i32) {
    %c0_i32 = arith.constant 0 : i32
    %c0_i32_0 = arith.constant 0 : i32
    return %c0_i32, %arg1 : i32, i32
  }
  func.func @transform_3(%arg0: i32, %arg1: i32) -> (i32, i32) {
    %c0_i32 = arith.constant 0 : i32
    return %arg0, %arg1 : i32, i32
  }
}

</mosaic_0001>

<bundles_post_ra>
// kernel: tpu_custom_call.1
= control target key start
LH: loop header
LB: loop body
LE: loop exit
PB: predicated region body
PF: predicated region fallthrough
CT: control target
= control target key end

     0   :  { %8 = vsyncpa [#allocation3], 0  ;;  %s408_s0 = inlined_call_operand.hbm [shape: f32[16,128], index: 0, kind: input, shape index: {}]   ;;  %s409_s1 = inlined_call_operand.hbm [shape: bf16[128,128], index: 1, kind: input, shape index: {}]   ;;  %s410_s2 = inlined_call_operand.vmem [shape: f32[1,128], index: 2, kind: input, shape index: {}]   ;;  %s411_s3 = inlined_call_operand.hbm [shape: f32[16,128], index: 3, kind: output, shape index: {}]  }
   0x1   :  { %9 = vsyncpa [#allocation6], 0 }
   0x2   :  { %10 = vsyncpa [#allocation4], 0  ;;  %s351_s12 = smov [#allocation2]  }
   0x3   :  { %s16_s13 = sshll.u32 %s351_s12, 4  ;;  %s17_s13 = int_to_ptr.vmem [resolvable:$true] %s16_s13 }
   0x4   :  { %s293_s14 = scalar_lea.vmem %s17_s13, 256  ;;  %p298_p1 = scmp.lt.s32.totalorder %s17_s13, %s17_s13 }
   0x5   :  { %p294_p0 = scmp.ne.s32.totalorder %s17_s13, %s293_s14  ;;  %p299_p2 = scmp.lt.s32.totalorder %s293_s14, %s293_s14 }
   0x7   :  { %p300_p3 = por %p299_p2, %p298_p1 }
   0x9   :  { %p301_p4 = pnand %p300_p3, %p294_p0 }
   0xb   :  { %304 = shalt.err (!%p301_p4)
}
   0xc   :  { %s352_s15 = smov 128   ;;  %s353_s16 = smov 8  }
   0xd   :  { %22 = dma.hbm_to_vmem [thread:$0]  %s408_s0, 256, %s17_s13, [#allocation3], %s352_s15, %s352_s15, %s353_s16  }
   0xe   :  { %s354_s19 = smov [#allocation5]  }
   0xf   :  { %s28_s20 = sshll.u32 %s354_s19, 4  ;;  %s29_s20 = int_to_ptr.vmem [resolvable:$true] %s28_s20 }
  0x10   :  { %s313_s21 = scalar_lea.vmem %s29_s20, 1024  ;;  %p318_p6 = scmp.lt.s32.totalorder %s29_s20, %s29_s20 }
  0x11   :  { %p314_p5 = scmp.ne.s32.totalorder %s29_s20, %s313_s21  ;;  %p319_p7 = scmp.lt.s32.totalorder %s313_s21, %s313_s21 }
  0x13   :  { %p320_p8 = por %p319_p7, %p318_p6 }
  0x15   :  { %p321_p9 = pnand %p320_p8, %p314_p5 }
  0x17   :  { %324 = shalt.err (!%p321_p9)
}
  0x18   :  { %s355_s22 = smov 64   ;;  %s356_s23 = smov 4  }
  0x19   :  { %34 = dma.hbm_to_vmem [thread:$0]  %s409_s1, 1024, %s29_s20, [#allocation6], %s355_s22, %s355_s22, %s356_s23  }
  0x1a   :  { %345 = dma.done.wait [#allocation3], 256  }
  0x1b   :  { %346 = vsyncadd [#allocation3], 4294967040 }
  0x1c   :  { %347 = dma.done.wait [#allocation6], 1024  }
  0x1d   :  { %348 = vsyncadd [#allocation6], 4294966272  ;;  %v389_v0 = vld [vmem:[#allocation2] sm:$0xff]  ;;  %v391_v1 = vld [vmem:[#allocation2 + $0x8] sm:$0xff]  ;;  %v357_v11 = vmov 0.0   ;;  %vm358_vm0 = vmmov 0  }
  0x1e   :  { %46 = vadd.xlane.f32.xlu0 %v389_v0  ;;  %v269_v10 = vld [vmem:[#allocation5 + $0x38] sm:$0xff]   ;;  %240 = vmatprep.subr.bf16.mxu0 %v357_v11  ;;  %v270_v12 = vld [vmem:[#allocation5 + $0x30] sm:$0xff]   ;;  %v271_v13 = vld [vmem:[#allocation5 + $0x28] sm:$0xff]   ;;  %s359_s26 = smov [#allocation7]  }
  0x1f   :  { %241 = vmatpush3.bf16.msra.mxu0 %v269_v10  ;;  %v272_v14 = vld [vmem:[#allocation5 + $0x20] sm:$0xff]   ;;  %v273_v15 = vld [vmem:[#allocation5 + $0x18] sm:$0xff]   ;;  %256 = vmatprep.mubr.msk.bf16.mxu0 %vm358_vm0, %v357_v11  ;;  %v274_v16 = vld [vmem:[#allocation5 + $0x10] sm:$0xff]   ;;  %s209_s27 = sshll.u32 %s359_s26, 4  ;;  %s210_s27 = int_to_ptr.vmem [resolvable:$true] %s209_s27 }
  0x20   :  { %242 = vmatprep.subr.bf16.mxu0 %v357_v11  ;;  %v275_v17 = vld [vmem:[#allocation5 + $0x8] sm:$0xff]   ;;  %v276_v18 = vld [vmem:[#allocation5] sm:$0xff]   ;;  %v222_v40 = vld [vmem:[%s410_s2] ss:$0 sm:$0xff]  ;;  %s325_s28 = scalar_lea.vmem %s210_s27, 256  ;;  %p330_p11 = scmp.lt.s32.totalorder %s210_s27, %s210_s27 }
  0x21   :  { %p326_p10 = scmp.ne.s32.totalorder %s210_s27, %s325_s28  ;;  %p331_p12 = scmp.lt.s32.totalorder %s325_s28, %s325_s28 }
  0x22   :  { %48 = vadd.xlane.f32.xlu0 %v391_v1 }
  0x23   :  { %243 = vmatpush3.bf16.msra.mxu0 %v270_v12  ;;  %p332_p13 = por %p331_p12, %p330_p11 }
  0x24   :  { %244 = vmatprep.subr.bf16.mxu0 %v357_v11 }
  0x25   :  { %p333_p0 = pnand %p332_p13, %p326_p10 }
  0x27   :  { %245 = vmatpush3.bf16.msra.mxu0 %v271_v13 }
  0x28   :  { %246 = vmatprep.subr.bf16.mxu0 %v357_v11 }
  0x2b   :  { %247 = vmatpush3.bf16.msra.mxu0 %v272_v14 }
  0x2c   :  { %248 = vmatprep.subr.bf16.mxu0 %v357_v11 }
  0x2f   :  { %249 = vmatpush3.bf16.msra.mxu0 %v273_v15 }
  0x30   :  { %250 = vmatprep.subr.bf16.mxu0 %v357_v11 }
  0x33   :  { %251 = vmatpush3.bf16.msra.mxu0 %v274_v16 }
  0x34   :  { %252 = vmatprep.subr.bf16.mxu0 %v357_v11 }
  0x37   :  { %253 = vmatpush3.bf16.msra.mxu0 %v275_v17 }
  0x38   :  { %254 = vmatprep.subr.bf16.mxu0 %v357_v11 }
  0x3b   :  { %255 = vmatpush3.bf16.msra.mxu0 %v276_v18 }
  0xa7   :  { %v47_v2 = vpop.xlane.xlu0 %46 }
  0xa8   :  { %v51_v3 = vmul.f32 0.0078125, %v47_v2 }
  0xaa   :  { %v53_v4 = vsub.f32 %v389_v0, %v51_v3 }
  0xab   :  { %v49_v5 = vpop.xlane.xlu0 %48 }
  0xac   :  { %v52_v6 = vmul.f32 0.0078125, %v49_v5  ;;  %v55_v7 = vmul.f32 %v53_v4, %v53_v4 }
  0xae   :  { %v54_v8 = vsub.f32 %v391_v1, %v52_v6  ;;  %57 = vadd.xlane.f32.xlu1 %v55_v7 }
  0xb0   :  { %v56_v9 = vmul.f32 %v54_v8, %v54_v8 }
  0xb2   :  { %59 = vadd.xlane.f32.xlu1 %v56_v9 }
 0x137   :  { %v58_v19 = vpop.xlane.xlu1 %57 }
 0x138   :  { %v61_v20 = vmul.f32 0.007874016, %v58_v19 }
 0x13a   :  { %277 = vrsqrt.f32 %v61_v20  ;;  %vm65_vm1 = vcmp.eq.f32.partialorder %v61_v20, inf  ;;  %v68_v25 = vand.u32 2147483648, %v61_v20  ;;  %vm67_vm2 = vcmp.eq.f32.partialorder %v61_v20, 0.0 }
 0x13b   :  { %v60_v21 = vpop.xlane.xlu1 %59 }
 0x13c   :  { %v62_v22 = vmul.f32 0.007874016, %v60_v21 }
 0x13e   :  { %279 = vrsqrt.f32 %v62_v22  ;;  %vm72_vm3 = vcmp.eq.f32.partialorder %v62_v22, inf  ;;  %v75_v31 = vand.u32 2147483648, %v62_v22  ;;  %vm74_vm4 = vcmp.eq.f32.partialorder %v62_v22, 0.0 }
 0x147   :  { %v278_v23 = vpop.eup %277 }
 0x148   :  { %v64_v24 = vmul.f32 %v278_v23, %v61_v20 }
 0x14a   :  { %v66_v26 = vsel %vm65_vm1, %v61_v20, %v64_v24 }
 0x14b   :  { %v280_v27 = vpop.eup %279  ;;  %v69_v28 = vsel %vm67_vm2, %v68_v25, %v66_v26 }
 0x14c   :  { %v71_v29 = vmul.f32 %v280_v27, %v62_v22  ;;  %v77_v30 = vadd.f32 1e-06, %v69_v28 }
 0x14e   :  { %v73_v32 = vsel %vm72_vm3, %v62_v22, %v71_v29  ;;  %281 = vrcp.f32 %v77_v30 }
 0x14f   :  { %v76_v33 = vsel %vm74_vm4, %v75_v31, %v73_v32 }
 0x150   :  { %v78_v34 = vadd.f32 1e-06, %v76_v33 }
 0x152   :  { %283 = vrcp.f32 %v78_v34 }
 0x15b   :  { %v282_v35 = vpop.eup %281 }
 0x15c   :  { %v83_v37 = vmul.f32 %v282_v35, %v53_v4 }
 0x15f   :  { %v284_v36 = vpop.eup %283 }
 0x160   :  { %v84_v38 = vmul.f32 %v284_v36, %v54_v8 }
 0x162   :  { %v87_v39 = vpack.c.bf16 %v84_v38, %v83_v37 }
 0x164   :  { %257 = vmatmul.mubr.bf16.vlgmr.msra.gmra.mxu0 %v87_v39 }
 0x224   :  { %v193_v41 = vpop.f32.mrf.mxu0 }
 0x225   :  { %v194_v42 = vadd.f32 %v222_v40, %v193_v41 }
 0x226   :  { %v258_v43 = vpop.f32.mrf.mxu0 }
 0x227   :  { %v200_v44 = vadd.f32 %v194_v42, %v389_v0 }
 0x228   :  { %v196_v45 = vpop.f32.mrf.mxu0 }
 0x229   :  { %202 = vst [vmem:[#allocation7] sm:$0xff] %v200_v44  ;;  %v197_v46 = vadd.f32 %v222_v40, %v196_v45 }
 0x22a   :  { %v259_v47 = vpop.f32.mrf.mxu0 }
 0x22b   :  { %v201_v48 = vadd.f32 %v197_v46, %v391_v1 }
 0x22d   :  { %203 = vst [vmem:[#allocation7 + $0x8] sm:$0xff] %v201_v48 }
 0x22e   :  { %336 = shalt.err (!%p333_p0)
}
 0x22f   :  { %215 = dma.vmem_to_hbm [thread:$0]  %s210_s27, 256, %s411_s3, [#allocation4], %s352_s15, %s352_s15, %s353_s16  }
 0x230   :  { %349 = dma.done.wait [#allocation4], 256  }
 0x231   :  { %350 = vsyncadd [#allocation4], 4294967040 }
 0x232   :  { %219 = vsyncpa [#allocation3], 1 }
 0x233   :  { %220 = vsyncpa [#allocation6], 1 }
 0x234   :  { %221 = vsyncpa [#allocation4], 1 }

</bundles_post_ra>
